<compile_context>
chip_gen: v6e
topology: v6e:2x2x1
jax: 0.10.0
libtpu: 0.0.40
codegen_flags: <defaults>
</compile_context>

<pallas_src>
import functools

import numpy as np

import jax
import jax.numpy as jnp
from jax.experimental import pallas as pl
from jax.experimental.pallas import tpu as pltpu


def _build_weights(L, kernel_size, stride):
    """Banded (Lo, L) matrix folding replicate padding + k-tap mean + stride."""
    pad = (kernel_size - 1) // 2
    P = L + 2 * pad
    Lo = (P - kernel_size) // stride + 1
    if Lo < 1:
        raise ValueError("kernel_size too large for this sequence length")
    idx = np.arange(Lo)[:, None] * stride + np.arange(kernel_size)[None, :] - pad
    idx = np.clip(idx, 0, L - 1)                      # replicate padding == clamp
    W = np.zeros((Lo, L), dtype=np.float32)
    rows = np.repeat(np.arange(Lo), kernel_size)
    np.add.at(W, (rows, idx.reshape(-1)), 1.0 / kernel_size)
    return W, Lo


def _moving_avg_kernel(w_ref, x_ref, o_ref, *, channels_last):
    # channels_last:  x (Bb, L, C), w (Lo, L) -> o (Bb, Lo, C) = w @ x[b]
    # time-on-lanes:  x (Bb, C, L), w (L, Lo) -> o (Bb, C, Lo) = x[b] @ w
    w = w_ref[...]
    Bb = x_ref.shape[0]
    for b in range(Bb):                 # Bb is capped small by the wrapper; unrolled MXU matmuls
        xb = x_ref[b]
        if xb.dtype != jnp.float32:
            xb = xb.astype(jnp.float32)
        if channels_last:
            r = jnp.dot(w, xb, preferred_element_type=jnp.float32,
                        precision=jax.lax.Precision.HIGHEST)
        else:
            r = jnp.dot(xb, w, preferred_element_type=jnp.float32,
                        precision=jax.lax.Precision.HIGHEST)
        o_ref[b] = r.astype(o_ref.dtype)


def _pick_batch_block(B, bytes_per_row, requested):
    if requested is not None:
        if B % requested != 0:
            raise ValueError("batch_block must divide batch")
        return requested
    budget = 4 * 1024 * 1024                     # ~4 MiB input block: safe on v7x's 64 MiB VMEM
    cap = max(1, min(16, budget // max(1, bytes_per_row)))
    if B > 1:
        cap = min(cap, max(1, B // 2))           # grid >= 2 steps so both v7x TCs get work
    best = 1
    for d in range(1, min(B, cap) + 1):
        if B % d == 0:
            best = d
    return best


def moving_avg_forward(x, kernel_size, stride=1, batch_block=None, channels_last=None):
    """Pallas implementation of moving_avg.forward for x of shape (B, L, C)."""
    B, L, C = x.shape
    W_np, Lo = _build_weights(L, kernel_size, stride)

    if channels_last is None:
        # Put the larger of (C, Lo) on the 128-wide lane axis of the output.
        channels_last = C >= Lo

    itemsize = jnp.dtype(x.dtype).itemsize
    Bb = _pick_batch_block(B, L * C * itemsize, batch_block)

    if channels_last:
        w = jnp.asarray(W_np)                               # (Lo, L)
        x_in = x                                            # (B, L, C), C on lanes
        x_block, o_block = (Bb, L, C), (Bb, Lo, C)
        out_struct = jax.ShapeDtypeStruct((B, Lo, C), x.dtype)
    else:
        w = jnp.asarray(W_np.T)                             # (L, Lo)
        x_in = jnp.transpose(x, (0, 2, 1))                  # (B, C, L), time on lanes
        x_block, o_block = (Bb, C, L), (Bb, C, Lo)
        out_struct = jax.ShapeDtypeStruct((B, C, Lo), x.dtype)

    block_bytes = Bb * (L * C + Lo * C) * itemsize + W_np.size * 4
    vmem_limit = int(min(48 << 20, max(16 << 20, 8 * block_bytes)))

    kernel = functools.partial(_moving_avg_kernel, channels_last=channels_last)

    out = pl.pallas_call(
        kernel,
        out_shape=out_struct,
        grid_spec=pltpu.PrefetchScalarGridSpec(
            num_scalar_prefetch=0,
            grid=(B // Bb,),
            in_specs=[
                pl.BlockSpec(tuple(w.shape), lambda b: (0, 0)),   # resident weight band
                pl.BlockSpec(x_block, lambda b: (b, 0, 0)),
            ],
            out_specs=pl.BlockSpec(o_block, lambda b: (b, 0, 0)),
        ),
        compiler_params=pltpu.CompilerParams(
            dimension_semantics=("parallel",),
            vmem_limit_bytes=vmem_limit),
    )(w, x_in)

    if not channels_last:
        out = jnp.transpose(out, (0, 2, 1))                 # back to (B, Lo, C)
    return out


def moving_avg_reference(x, kernel_size, stride):
    """Pure-JAX reference mirroring the PyTorch module (gather-based windows)."""
    pad = (kernel_size - 1) // 2
    front = jnp.repeat(x[:, 0:1, :], pad, axis=1)
    end = jnp.repeat(x[:, -1:, :], pad, axis=1)
    xp = jnp.concatenate([front, x, end], axis=1)
    P = xp.shape[1]
    Lo = (P - kernel_size) // stride + 1
    idx = jnp.arange(Lo)[:, None] * stride + jnp.arange(kernel_size)[None, :]
    windows = xp[:, idx, :]                                 # (B, Lo, k, C)
    return windows.mean(axis=2).astype(x.dtype)


if __name__ == "__main__":
    key = jax.random.PRNGKey(0)
    k1, k2, k3 = jax.random.split(key, 3)

    # Case 1: DLinear-style moving average, lane-dense channels (C = 128).
    B1, L1, C1, K1, S1 = 2, 96, 128, 25, 1
    x1 = jax.random.normal(k1, (B1, L1, C1), dtype=jnp.float32)
    out1 = jax.block_until_ready(moving_avg_forward(x1, K1, S1))
    ref1 = moving_avg_reference(x1, K1, S1)
    assert out1.shape == ref1.shape == (B1, L1, C1)
    assert jnp.allclose(out1, ref1, atol=1e-4, rtol=1e-4), "case 1 mismatch"

    # Case 2: small, non-lane-aligned channel count -> time-on-lanes layout.
    B2, L2, C2, K2, S2 = 2, 24, 7, 5, 1
    x2 = jax.random.normal(k2, (B2, L2, C2), dtype=jnp.float32)
    out2 = jax.block_until_ready(moving_avg_forward(x2, K2, S2))
    ref2 = moving_avg_reference(x2, K2, S2)
    assert out2.shape == ref2.shape == (B2, L2, C2)
    assert jnp.allclose(out2, ref2, atol=1e-4, rtol=1e-4), "case 2 mismatch"

    # Case 3: stride > 1 -- handled by the same banded matmul (no unrolled windows).
    B3, L3, C3, K3, S3 = 4, 32, 16, 7, 2
    x3 = jax.random.normal(k3, (B3, L3, C3), dtype=jnp.float32)
    out3 = jax.block_until_ready(moving_avg_forward(x3, K3, S3))
    ref3 = moving_avg_reference(x3, K3, S3)
    assert out3.shape == ref3.shape
    assert jnp.allclose(out3, ref3, atol=1e-4, rtol=1e-4), "case 3 mismatch"

    print("KERNEL_OK")
</pallas_src>

<mosaic_0001>
module attributes {stable_mosaic.version = 11 : i64} {
  func.func @_moving_avg_kernel(%arg0: i32, %arg1: memref<96x96xf32, #tpu.memory_space<vmem>>, %arg2: memref<1x96x128xf32, #tpu.memory_space<vmem>>, %arg3: memref<1x96x128xf32, #tpu.memory_space<vmem>>) attributes {dimension_semantics = [#tpu.dimension_semantics<parallel>], iteration_bounds = array<i64: 2>, scalar_prefetch = 0 : i64, scratch_operands = 0 : i64, tpu.core_type = #tpu.core_type<tc>, window_params = [{pipeline_mode = #tpu.pipeline_mode<synchronous>, transform_indices = @transform_0, window_bounds = array<i64: 96, 96>}, {transform_indices = @transform_1, window_bounds = array<i64: 1, 96, 128>}, {transform_indices = @transform_2, window_bounds = array<i64: 1, 96, 128>}]} {
    %c0 = arith.constant 0 : index
    %c0_0 = arith.constant 0 : index
    %0 = vector.load %arg1[%c0, %c0_0] : memref<96x96xf32, #tpu.memory_space<vmem>>, vector<96x96xf32>
    %c0_1 = arith.constant 0 : index
    %c0_2 = arith.constant 0 : index
    %c0_3 = arith.constant 0 : index
    %1 = vector.load %arg2[%c0_1, %c0_2, %c0_3] : memref<1x96x128xf32, #tpu.memory_space<vmem>>, vector<1x96x128xf32>
    %2 = vector.shape_cast %1 : vector<1x96x128xf32> to vector<96x128xf32>
    %cst = arith.constant dense<0.000000e+00> : vector<96x128xf32>
    %3 = tpu.matmul %0, %2, %cst {dimension_numbers = #tpu.dot_dimension_numbers<[1], [0], [0], [1], [0, 0, 1, 1], [], []>, precision = #tpu.contract_precision<fp32>} : vector<96x96xf32>, vector<96x128xf32>, vector<96x128xf32> -> vector<96x128xf32>
    %c0_4 = arith.constant 0 : index
    %c0_5 = arith.constant 0 : index
    %c0_6 = arith.constant 0 : index
    %4 = vector.load %arg3[%c0_4, %c0_5, %c0_6] : memref<1x96x128xf32, #tpu.memory_space<vmem>>, vector<1x96x128xf32>
    %5 = vector.shape_cast %4 : vector<1x96x128xf32> to vector<96x128xf32>
    %6 = vector.shape_cast %3 : vector<96x128xf32> to vector<1x96x128xf32>
    tpu.vector_store %arg3[%c0_4, %c0_5, %c0_6], %6 {strides = array<i32>} : memref<1x96x128xf32, #tpu.memory_space<vmem>>, vector<1x96x128xf32>,
    return
  }
  func.func @transform_0(%arg0: i32) -> (i32, i32) {
    %c0_i32 = arith.constant 0 : i32
    %c0_i32_0 = arith.constant 0 : i32
    %c0_i32_1 = arith.constant 0 : i32
    return %c0_i32, %c0_i32_0 : i32, i32
  }
  func.func @transform_1(%arg0: i32) -> (i32, i32, i32) {
    %c0_i32 = arith.constant 0 : i32
    %c0_i32_0 = arith.constant 0 : i32
    %c0_i32_1 = arith.constant 0 : i32
    return %arg0, %c0_i32, %c0_i32_0 : i32, i32, i32
  }
  func.func @transform_2(%arg0: i32) -> (i32, i32, i32) {
    %c0_i32 = arith.constant 0 : i32
    %c0_i32_0 = arith.constant 0 : i32
    %c0_i32_1 = arith.constant 0 : i32
    return %arg0, %c0_i32, %c0_i32_0 : i32, i32, i32
  }
}

</mosaic_0001>

<bundles_post_ra>
// kernel: tpu_custom_call.1
= control target key start
LH: loop header
LB: loop body
LE: loop exit
PB: predicated region body
PF: predicated region fallthrough
CT: control target
= control target key end

     0   :  { %7 = vsyncpa [#allocation3], 0  ;;  %s2746_s0 = inlined_call_operand.hbm [shape: f32[96,96], index: 0, kind: input, shape index: {}]   ;;  %s2747_s1 = inlined_call_operand.hbm [shape: f32[2,96,128], index: 1, kind: input, shape index: {}]   ;;  %s2748_s2 = inlined_call_operand.hbm [shape: f32[2,96,128], index: 2, kind: output, shape index: {}]  }
   0x1   :  { %8 = vsyncpa [#allocation6], 0 }
   0x2   :  { %10 = vsyncpa [#allocation6 + $0x1], 0 }
   0x3   :  { %11 = vsyncpa [#allocation4], 0 }
   0x4   :  { %13 = vsyncpa [#allocation4 + $0x1], 0  ;;  %s2028_s9 = smov 0   ;;  %s2030_s10 = smov 0  }
   0x5   :  { %s2032_s11 = smov 0   ;;  %s2034_s12 = smov 0  }
   0x6 LB: > { %s2049_s13 = sadd.s32 4294967295, %s2004_s12   ;;  %s1411_s14 = sadd.s32 4294967294, %s2004_s12   ;;  %s2004_s12 = sphi %s2034_s12, %s2810_s12   ;;  %s2000_s11 = sphi %s2032_s11, %s2809_s11   ;;  %s1996_s10 = sphi %s2030_s10, %s2808_s10   ;;  %s1992_s9 = sphi %s2028_s9, %s2807_s9  }
   0x7   : > { %p60_p0 = scmp.ne.s32.totalorder %s1996_s10, %s1992_s9  ;;  %p2749_p1 = scmp.eq.s32.totalorder %s2049_s13, 0 }
   0x8   : > { %p90_p3 = scmp.eq.s32.totalorder %s1411_s14, 1  ;;  %p1412_p5 = scmp.ge.s32.totalorder %s2004_s12, 1 }
   0x9   : > { %p2058_p4 = por %p2749_p1, %p60_p0  ;;  %p97_p7 = scmp.lt.s32.totalorder %s2004_s12, 3 }
   0xa   : > { %p2063_p6 = por %p90_p3, %p60_p0  ;;  %s2006_s18 = smov [#allocation2]  }
   0xb   : > { %s2772_s15 = scalar_select %p2058_p4, 1, 0 }
   0xc   : > { %s2773_s16 = scalar_select %p2063_p6, 1, 0 }
   0xd   : > { %p2068_p8 = pnand %p1412_p5, %p97_p7  ;;  %s109_s19 = sshll.u32 %s2006_s18, 4  ;;  %s110_s19 = int_to_ptr.vmem [resolvable:$true] %s109_s19 }
   0xe   : > { %s2082_s21 = sadd.s32 1, %s2004_s12   ;;  %s47_s22 = sadd.s32 1, %s2000_s11 }
   0xf   : > { %s2774_s17 = scalar_select %p2068_p8, 1, 0 }
  0x10   : > { %p1829_p9 = pneg %p2068_p8  ;;  %s44_s23 = ssub.s32 %s2004_s12, %s2082_s21 }
  0x11   : > { %s1893_s24 = scalar_lea.vmem %s110_s19, 1536  ;;  %p1901_p5 = scmp.lt.s32.totalorder %s110_s19, %s110_s19 }
  0x12   : > { %p2077_p11 = pnand %p1829_p9, %p2749_p1  ;;  %p1894_p13 = scmp.ne.s32.totalorder %s110_s19, %s1893_s24 }
  0x13   : > { %p1902_p7 = scmp.lt.s32.totalorder %s1893_s24, %s1893_s24 }
  0x14   : > { %p1884_p12 = pneg %p2077_p11 }
  0x15   : > { %p1903_p10 = por %p1902_p7, %p1901_p5 }
  0x16   : > { %p1896_p0 = pnand %p1894_p13, %p1884_p12 }
  0x18   : > { %p1897_p3 = pneg %p1896_p0 }
  0x1a   : > { %p1904_p2 = pnand %p1903_p10, %p1897_p3 }
  0x1c   : > { %1907 = shalt.err (!%p1904_p2)
}
  0x1d   : > { %s2007_s25 = smov 128   ;;  %s2008_s26 = smov 8  }
  0x1e   : > { %1832 = dma.hbm_to_vmem [thread:$0]  (!%p2077_p11), %s2746_s0, 1536, %s110_s19, [#allocation3], %s2007_s25, %s2007_s25, %s2008_s26  }
  0x1f   : > { %p45_p2 = scmp.eq.s32.totalorder %s44_s23, 0  ;;  %p54_p9 = scmp.ne.s32.totalorder %s2000_s11, %s1996_s10 }
  0x20   : > { %p55_p10 = scmp.eq.s32.totalorder %s2004_s12, 0  ;;  %p1842_p12 = scmp.lt.s32.totalorder %s2004_s12, 2 }
  0x21   : > { %s2102_s29 = scalar_select %p45_p2, %s2000_s11, %s47_s22  }
  0x22   : > { %p56_p13 = por %p55_p10, %p54_p9  ;;  %p2776_p0 = scmp.eq.s32.totalorder %s2049_s13, 1 }
  0x23   : > { %s123_s3 = sand.u32 1, %s2000_s11   ;;  %s1818_s4 = smul.u32 1536, %s2004_s12 }
  0x24   : > { %p2106_p3 = por %p2776_p0, %p54_p9  ;;  %s1817_s5 = smul.u32 96, %s123_s3 }
  0x25   : > { %p2112_p5 = pnand %p1842_p12, %p56_p13  ;;  %s2119_s14 = scalar_lea.hbm %s2747_s1, %s1818_s4 }
  0x26   : > { %s2777_s30 = scalar_select %p2106_p3, 1, 0 }
  0x27   : > { %s127_s18 = scalar_lea.vmem [#allocation5], %s1817_s5  ;;  %s2123_s20 = scalar_lea.sflag [#allocation6], %s123_s3 }
  0x28   : > { %s134_s19 = sshll.u32 %s127_s18, 4  ;;  %s1908_s22 = scalar_lea.hbm %s2119_s14, 1536  ;;  %s2121_s19 = int_to_ptr.vmem [resolvable:$true] %s134_s19 }
  0x29   : > { %p1909_p11 = scmp.ne.s32.totalorder %s2119_s14, %s1908_s22  ;;  %p1910_p7 = pneg %p2112_p5 }
  0x2a   : > { %s1913_s27 = scalar_lea.hbm %s2747_s1, 3072  ;;  %p1914_p10 = scmp.lt.s32.totalorder %s2119_s14, %s2747_s1 }
  0x2b   : > { %p1911_p2 = pnand %p1910_p7, %p1909_p11  ;;  %p1915_p12 = scmp.lt.s32.totalorder %s1913_s27, %s1908_s22 }
  0x2d   : > { %p1912_p9 = pneg %p1911_p2  ;;  %p1916_p13 = por %p1915_p12, %p1914_p10 }
  0x2f   : > { %p1917_p0 = pnand %p1916_p13, %p1912_p9 }
  0x31   : > { %1920 = shalt.err (!%p1917_p0)
}
  0x32   : > { %s1921_s3 = scalar_lea.vmem %s2121_s19, 1536  ;;  %s2009_s5 = smov [#allocation5]  }
  0x33   : > { %p1922_p1 = scmp.ne.s32.totalorder %s2121_s19, %s1921_s3  ;;  %s1926_s7 = sshll.u32 %s2009_s5, 4  ;;  %s1927_s7 = int_to_ptr.vmem [resolvable:$false] %s1926_s7 }
  0x34   : > { %s1928_s8 = scalar_lea.vmem %s1927_s7, 3072  ;;  %p1929_p2 = scmp.lt.s32.totalorder %s2121_s19, %s1927_s7 }
  0x35   : > { %p1924_p6 = pnand %p1922_p1, %p1910_p7  ;;  %p1930_p3 = scmp.lt.s32.totalorder %s1928_s8, %s1921_s3 }
  0x37   : > { %p1925_p11 = pneg %p1924_p6  ;;  %p1931_p4 = por %p1930_p3, %p1929_p2 }
  0x39   : > { %p1932_p8 = pnand %p1931_p4, %p1925_p11 }
  0x3b   : > { %1935 = shalt.err (!%p1932_p8)
}
  0x3c   : > { %1836 = dma.hbm_to_vmem [thread:$0]  (!%p2112_p5), %s2119_s14, 1536, %s2121_s19, %s2123_s20, %s2007_s25, %s2007_s25, %s2008_s26  }
  0x3d   : > { %p2779_p1 = scmp.ne.s32.totalorder %s2774_s17, 0 }
  0x3f   : > { %146 = sbr.rel (%p2779_p1) target bundleno = 414 (0x19e), region = 28 }
  0x44   : > { %p2780_p6 = scmp.eq.s32.totalorder %s2049_s13, 0 }
  0x46   : > { %1979 = dma.done.wait (%p2780_p6), [#allocation3], 1536   ;;  %p2781_p7 = pmov %p2780_p6 }
  0x47   : > { %s2154_s18 = sand.u32 1, %s1996_s10   ;;  %p2782_p4 = scmp.ne.s32.totalorder %s2772_s15, 0 }
  0x48   : > { %1981 = vsyncadd (%p2781_p7), [#allocation3], 4294965760  ;;  %s1819_s6 = smul.u32 96, %s2154_s18  ;;  %s153_s22 = scalar_lea.sflag [#allocation6], %s2154_s18 }
  0x4a   : > { %s2160_s25 = scalar_lea.vmem [#allocation5], %s1819_s6 }
  0x4b   : > { %1983 = dma.done.wait (%p2782_p4), %s153_s22, 1536  }
  0x4c   : > { %1985 = vsyncadd (%p2782_p4), %s153_s22, 4294965760  ;;  %v200_v0 = vld [vmem:[%s2160_s25 + $0x58] sm:$0xff]  ;;  %v199_v1 = vld [vmem:[%s2160_s25 + $0x50] sm:$0xff]  ;;  %vm201_vm0 = vcmask 785408   ;;  %s2661_s15 = scalar_lea.vmem [#allocation7], %s1819_s6  ;;  %s1820_s17 = smul.u32 1536, %s2049_s13 }
  0x4d   : > { %v198_v2 = vld [vmem:[%s2160_s25 + $0x48] sm:$0xff]  ;;  %v2169_v3 = vand.u32 4294901760, %v200_v0  ;;  %v2171_v4 = vand.u32 4294901760, %v199_v1  ;;  %v197_v6 = vld [vmem:[%s2160_s25 + $0x40] sm:$0xff]  ;;  %v196_v7 = vld [vmem:[%s2160_s25 + $0x38] sm:$0xff]  ;;  %s1326_s26 = sshll.u32 %s2661_s15, 4  ;;  %s2701_s26 = int_to_ptr.vmem [resolvable:$true] %s1326_s26 }
  0x4e   : > { %v2173_v5 = vand.u32 4294901760, %v198_v2  ;;  %v195_v8 = vld [vmem:[%s2160_s25 + $0x30] sm:$0xff]  ;;  %v2178_v9 = vand.u32 4294901760, %v197_v6  ;;  %v2180_v10 = vand.u32 4294901760, %v196_v7  ;;  %v194_v12 = vld [vmem:[%s2160_s25 + $0x28] sm:$0xff]  ;;  %v193_v13 = vld [vmem:[%s2160_s25 + $0x20] sm:$0xff]  ;;  %s2699_s20 = scalar_lea.hbm %s2748_s2, %s1820_s17 }
  0x4f   : > { %v2182_v11 = vand.u32 4294901760, %v195_v8  ;;  %1565 = vmatprep.subr.mxu0 %v2169_v3  ;;  %v2188_v14 = vsub.f32 %v200_v0, %v2169_v3  ;;  %v2191_v15 = vsub.f32 %v199_v1, %v2171_v4  ;;  %v2193_v16 = vand.u32 4294901760, %v194_v12  ;;  %v192_v18 = vld [vmem:[%s2160_s25 + $0x18] sm:$0xff]  ;;  %v191_v25 = vld [vmem:[%s2160_s25 + $0x10] sm:$0xff]  ;;  %v190_v33 = vld [vmem:[%s2160_s25 + $0x8] sm:$0xff]  ;;  %s1313_s13 = scalar_lea.sflag [#allocation4], %s2154_s18 }
  0x50   : > { %v2196_v17 = vsub.f32 %v198_v2, %v2173_v5  ;;  %1566 = vmatpush3.msra.mxu0 %v2169_v3  ;;  %v2201_v19 = vsub.f32 %v197_v6, %v2178_v9  ;;  %v2204_v20 = vsub.f32 %v196_v7, %v2180_v10  ;;  %v2216_v24 = vand.u32 4294901760, %v193_v13  ;;  %v2243_v35 = vld [vmem:[%s2160_s25] sm:$0xff]  ;;  %v178_v39 = vld [vmem:[#allocation2 + $0x8] sm:$0xff]  ;;  %v179_v48 = vld [vmem:[#allocation2 + $0x10] sm:$0xff]  ;;  %s1936_s23 = scalar_lea.vmem %s2701_s26, 1536  ;;  %p2804_p3 = scmp.ne.s32.totalorder %s2777_s30, 0 }
  0x51   : > { %1567 = vmatprep.subr.mxu0 %v2171_v4  ;;  %v2208_v21 = vand.u32 4294901760, %v2188_v14  ;;  %v2211_v22 = vand.u32 4294901760, %v2191_v15  ;;  %v2223_v27 = vand.u32 4294901760, %v192_v18  ;;  %v2229_v29 = vsub.f32 %v195_v8, %v2182_v11  ;;  %v177_v38 = vld [vmem:[#allocation2] sm:$0xff]  ;;  %v180_v57 = vld [vmem:[#allocation2 + $0x18] sm:$0xff]  ;;  %p1937_p8 = scmp.ne.s32.totalorder %s2701_s26, %s1936_s23  ;;  %s2010_s24 = smov [#allocation7]  }
  0x52   : > { %v2214_v23 = vand.u32 4294901760, %v2196_v17  ;;  %1568 = vmatpush3.msra.mxu0 %v2171_v4  ;;  %v2221_v26 = vand.u32 4294901760, %v2201_v19  ;;  %v2226_v28 = vand.u32 4294901760, %v2204_v20  ;;  %v2240_v34 = vsub.f32 %v194_v12, %v2193_v16  ;;  %s1940_s27 = sshll.u32 %s2010_s24, 4  ;;  %s1941_s27 = int_to_ptr.vmem [resolvable:$false] %s1940_s27 }
  0x53   : > { %1569 = vmatprep.subr.mxu0 %v2173_v5  ;;  %v447_v30 = vsub.f32 %v2188_v14, %v2208_v21  ;;  %v454_v31 = vsub.f32 %v2191_v15, %v2211_v22  ;;  %v2248_v37 = vand.u32 4294901760, %v191_v25  ;;  %v2254_v43 = vand.u32 4294901760, %v2229_v29  ;;  %p1938_p5 = pnand %p1937_p8, %p2804_p3  ;;  %s1942_s28 = scalar_lea.vmem %s1941_s27, 3072 }
  0x54   : > { %v461_v32 = vsub.f32 %v2196_v17, %v2214_v23  ;;  %1570 = vmatpush3.msra.mxu0 %v2173_v5  ;;  %v468_v36 = vsub.f32 %v2201_v19, %v2221_v26  ;;  %v475_v42 = vsub.f32 %v2204_v20, %v2226_v28  ;;  %v2257_v44 = vand.u32 4294901760, %v190_v33  ;;  %p1943_p10 = scmp.lt.s32.totalorder %s2701_s26, %s1941_s27  ;;  %p1944_p12 = scmp.lt.s32.totalorder %s1942_s28, %s1936_s23 }
  0x55   : > { %1571 = vmatprep.subr.mxu0 %v2178_v9  ;;  %v448_v40 = vand.u32 4294901760, %v447_v30  ;;  %v455_v41 = vand.u32 4294901760, %v454_v31  ;;  %2783 = vst [vmem:[#allocation11_spill] sm:$0xff] %v2254_v43  ;;  %v2260_v45 = vand.u32 4294901760, %v2240_v34  ;;  %v2263_v46 = vand.u32 4294901760, %v2243_v35  ;;  %v181_v30 = vld [vmem:[#allocation2 + $0x20] sm:$0xff]  ;;  %p1939_p9 = pneg %p1938_p5 }
  0x56   : > { %1572 = vmatpush3.msra.mxu0 %v2178_v9  ;;  %v2266_v47 = vsub.f32 %v193_v13, %v2216_v24  ;;  %v462_v49 = vand.u32 4294901760, %v461_v32  ;;  %v203_v50 = vsel %vm201_vm0, %v177_v38, 0  ;;  %v206_v51 = vsel %vm201_vm0, %v178_v39, 0  ;;  %v182_v39 = vld [vmem:[#allocation2 + $0x28] sm:$0xff]  ;;  %p1945_p13 = por %p1944_p12, %p1943_p10 }
  0x57   : > { %2784 = vst [vmem:[#allocation12_spill] sm:$0xff] %v2260_v45  ;;  %1573 = vmatprep.subr.mxu0 %v2180_v10  ;;  %1607 = vmatprep.subr.mxu1 %v448_v40  ;;  %v2272_v52 = vsub.f32 %v192_v18, %v2223_v27  ;;  %v469_v53 = vand.u32 4294901760, %v468_v36  ;;  %v2278_v55 = vand.u32 4294901760, %v203_v50  ;;  %v2280_v56 = vand.u32 4294901760, %v206_v51 }
  0x58   : > { %1574 = vmatpush3.msra.mxu0 %v2180_v10  ;;  %1608 = vmatpush3.msra.mxu1 %v448_v40  ;;  %v2276_v54 = vand.u32 4294901760, %v2266_v47  ;;  %v476_v58 = vand.u32 4294901760, %v475_v42  ;;  %v482_v59 = vsub.f32 %v2229_v29, %v2254_v43  ;;  %v2286_v60 = vsub.f32 %v191_v25, %v2248_v37  ;;  %p1946_p0 = pnand %p1945_p13, %p1939_p9 }
  0x59   : > { %1575 = vmatprep.subr.mxu0 %v2182_v11  ;;  %1609 = vmatprep.subr.mxu1 %v455_v41  ;;  %v209_v61 = vsel %vm201_vm0, %v179_v48, 0  ;;  %v489_v62 = vsub.f32 %v2240_v34, %v2260_v45  ;;  %v2293_v63 = vsub.f32 %v203_v50, %v2278_v55  ;;  %v2296_v0 = vsub.f32 %v206_v51, %v2280_v56 }
  0x5a   : > { %2785 = vst [vmem:[#allocation13_spill] sm:$0xff] %v2276_v54  ;;  %1576 = vmatpush3.msra.mxu0 %v2182_v11  ;;  %1610 = vmatpush3.msra.mxu1 %v455_v41  ;;  %v2298_v1 = vand.u32 4294901760, %v209_v61  ;;  %v496_v2 = vsub.f32 %v2266_v47, %v2276_v54  ;;  %v2304_v6 = vand.u32 4294901760, %v2272_v52  ;;  %v2307_v7 = vand.u32 4294901760, %v2286_v60 }
  0x5b   : > { %1577 = vmatprep.subr.mxu0 %v2193_v16  ;;  %1611 = vmatprep.subr.mxu1 %v462_v49  ;;  %v212_v8 = vsel %vm201_vm0, %v180_v57, 0  ;;  %v2754_v12 = vand.u32 4294901760, %v2293_v63  ;;  %v2753_v13 = vand.u32 4294901760, %v2296_v0  ;;  %v2317_v25 = vsub.f32 %v190_v33, %v2257_v44 }
  0x5c   : > { %2786 = vst [vmem:[#allocation14_spill] sm:$0xff] %v2304_v6  ;;  %2787 = vst [vmem:[#allocation15_spill] sm:$0xff] %v2307_v7  ;;  %1578 = vmatpush3.msra.mxu0 %v2193_v16  ;;  %1612 = vmatpush3.msra.mxu1 %v462_v49  ;;  %v2314_v18 = vsub.f32 %v209_v61, %v2298_v1  ;;  %v483_v31 = vand.u32 4294901760, %v482_v59  ;;  %v2320_v32 = vand.u32 4294901760, %v212_v8  ;;  %v490_v40 = vand.u32 4294901760, %v489_v62  ;;  %v183_v49 = vld [vmem:[#allocation2 + $0x30] sm:$0xff] }
  0x5d   : > { %1579 = vmatprep.subr.mxu0 %v2216_v24  ;;  %1613 = vmatprep.subr.mxu1 %v469_v53  ;;  %v318_v36 = vsub.f32 %v2293_v63, %v2754_v12  ;;  %v328_v38 = vsub.f32 %v2296_v0, %v2753_v13  ;;  %v2336_v42 = vsub.f32 %v2243_v35, %v2263_v46  ;;  %v215_v48 = vsel %vm201_vm0, %v181_v30, 0  ;;  %v184_v59 = vld [vmem:[#allocation2 + $0x38] sm:$0xff]  ;;  %v185_v12 = vld [vmem:[#allocation2 + $0x40] sm:$0xff] }
  0x5e   : > { %1580 = vmatpush3.msra.mxu0 %v2216_v24  ;;  %1614 = vmatpush3.msra.mxu1 %v469_v53  ;;  %v2755_v33 = vand.u32 4294901760, %v2314_v18  ;;  %v2332_v41 = vsub.f32 %v212_v8, %v2320_v32  ;;  %v497_v50 = vand.u32 4294901760, %v496_v2  ;;  %v503_v51 = vsub.f32 %v2272_v52, %v2304_v6  ;;  %v186_v6 = vld [vmem:[#allocation2 + $0x48] sm:$0xff] }
  0x5f   : > { %1581 = vmatprep.subr.mxu0 %v2223_v27  ;;  %1615 = vmatprep.subr.mxu1 %v476_v58  ;;  %v510_v53 = vsub.f32 %v2286_v60, %v2307_v7  ;;  %v2345_v57 = vand.u32 4294901760, %v2317_v25  ;;  %v319_v35 = vand.u32 4294901760, %v318_v36  ;;  %v2349_v62 = vand.u32 4294901760, %v215_v48 }
  0x60   : > { %1582 = vmatpush3.msra.mxu0 %v2223_v27  ;;  %1616 = vmatpush3.msra.mxu1 %v476_v58  ;;  %v218_v58 = vsel %vm201_vm0, %v182_v39, 0  ;;  %v329_v2 = vand.u32 4294901760, %v328_v38  ;;  %v338_v8 = vsub.f32 %v2314_v18, %v2755_v33  ;;  %v221_v13 = vsel %vm201_vm0, %v183_v49, 0 }
  0x61   : > { %2788 = vst [vmem:[#allocation16_spill] sm:$0xff] %v2345_v57  ;;  %1583 = vmatprep.subr.mxu0 %v2248_v37  ;;  %1617 = vmatprep.subr.mxu1 %v483_v31  ;;  %v2356_v30 = vand.u32 4294901760, %v218_v58  ;;  %v2361_v36 = vand.u32 4294901760, %v2336_v42  ;;  %v2364_v39 = vsub.f32 %v215_v48, %v2349_v62  ;;  %v224_v38 = vsel %vm201_vm0, %v184_v59, 0 }
  0x62   : > { %1584 = vmatpush3.msra.mxu0 %v2248_v37  ;;  %1618 = vmatpush3.msra.mxu1 %v483_v31  ;;  %v2366_v31 = vand.u32 4294901760, %v221_v13  ;;  %v504_v33 = vand.u32 4294901760, %v503_v51  ;;  %v517_v49 = vsub.f32 %v2317_v25, %v2345_v57  ;;  %v2375_v7 = vand.u32 4294901760, %v224_v38 }
  0x63   : > { %1585 = vmatprep.subr.mxu0 %v2257_v44  ;;  %1619 = vmatprep.subr.mxu1 %v490_v40  ;;  %2789 = vst [vmem:[#allocation17_spill] sm:$0xff] %v2361_v36  ;;  %v2373_v61 = vsub.f32 %v218_v58, %v2356_v30  ;;  %v2790_v48 = vand.u32 4294901760, %v2332_v41  ;;  %v2768_v54 = vand.u32 4294901760, %v2364_v39  ;;  %v511_v51 = vand.u32 4294901760, %v510_v53 }
  0x64   : > { %1586 = vmatpush3.msra.mxu0 %v2257_v44  ;;  %1620 = vmatpush3.msra.mxu1 %v490_v40  ;;  %v227_v40 = vsel %vm201_vm0, %v185_v12, 0  ;;  %v2386_v57 = vsub.f32 %v221_v13, %v2366_v31  ;;  %v339_v45 = vand.u32 4294901760, %v338_v8  ;;  %v524_v43 = vsub.f32 %v2336_v42, %v2361_v36 }
  0x65   : > { %1587 = vmatprep.subr.mxu0 %v2263_v46  ;;  %1621 = vmatprep.subr.mxu1 %v497_v50  ;;  %v348_v59 = vsub.f32 %v2332_v41, %v2790_v48  ;;  %v2771_v58 = vand.u32 4294901760, %v2373_v61  ;;  %v230_v48 = vsel %vm201_vm0, %v186_v6, 0  ;;  %v518_v12 = vand.u32 4294901760, %v517_v49 }
  0x66   : > { %1588 = vmatpush3.msra.mxu0 %v2263_v46  ;;  %1589 = vmatprep.mubr.f32.mxu0 %v319_v35  ;;  %v358_v53 = vsub.f32 %v2364_v39, %v2768_v54  ;;  %v2396_v35 = vsub.f32 %v224_v38, %v2375_v7  ;;  %v2398_v13 = vand.u32 4294901760, %v227_v40  ;;  %v377_v8 = vand.u32 4294901760, %v2386_v57  ;;  %v188_v38 = vld [vmem:[#allocation2 + $0x58] sm:$0xff] }
  0x67   : > { %1622 = vmatpush3.msra.mxu1 %v497_v50  ;;  %1590 = vmatmul.mubr.f32.vlgmr.msra.gmra.mxu0 %v329_v2  ;;  %v187_v50 = vld [vmem:[#allocation2 + $0x50] sm:$0xff]  ;;  %v349_v2 = vand.u32 4294901760, %v348_v59  ;;  %v368_v6 = vsub.f32 %v2373_v61, %v2771_v58  ;;  %v2406_v49 = vand.u32 4294901760, %v230_v48  ;;  %v525_v54 = vand.u32 4294901760, %v524_v43 }
  0x68   : > { %1623 = vmatprep.subr.mxu1 %v504_v33  ;;  %1649 = vmatprep.subr.mxu0 %v2188_v14  ;;  %v387_v59 = vand.u32 4294901760, %v2396_v35  ;;  %v2412_v36 = vsub.f32 %v227_v40, %v2398_v13  ;;  %v236_v58 = vsel %vm201_vm0, %v188_v38, 0 }
  0x69   : > { %1624 = vmatpush3.msra.mxu1 %v504_v33  ;;  %1650 = vmatpush3.msra.mxu0 %v2188_v14  ;;  %v233_v33 = vsel %vm201_vm0, %v187_v50, 0  ;;  %v359_v14 = vand.u32 4294901760, %v358_v53  ;;  %v369_v43 = vand.u32 4294901760, %v368_v6 }
  0x6a   : > { %1625 = vmatprep.subr.mxu1 %v511_v51  ;;  %1651 = vmatprep.subr.mxu0 %v2191_v15  ;;  %v388_v40 = vsub.f32 %v2396_v35, %v387_v59 }
  0x6b   : > { %1592 = vmatprep.mubr.f32.mxu0 %v339_v45  ;;  %1626 = vmatpush3.msra.mxu1 %v511_v51  ;;  %v2421_v45 = vsub.f32 %v230_v48, %v2406_v49  ;;  %v2423_v51 = vand.u32 4294901760, %v233_v33 }
  0x6c   : > { %1652 = vmatpush3.msra.mxu0 %v2191_v15  ;;  %1627 = vmatprep.subr.mxu1 %v518_v12  ;;  %v378_v15 = vsub.f32 %v2386_v57, %v377_v8  ;;  %v389_v50 = vand.u32 4294901760, %v388_v40 }
  0x6d   : > { %1593 = vmatmul.mubr.f32.gmra.mxu0 %v349_v2  ;;  %1653 = vmatprep.subr.mxu0 %v2196_v17  ;;  %v407_v53 = vand.u32 4294901760, %v2421_v45 }
  0x6e   : > { %1628 = vmatpush3.msra.mxu1 %v518_v12  ;;  %1654 = vmatpush3.msra.mxu0 %v2196_v17  ;;  %v397_v17 = vand.u32 4294901760, %v2412_v36  ;;  %v2430_v12 = vand.u32 4294901760, %v236_v58  ;;  %v379_v48 = vand.u32 4294901760, %v378_v15 }
  0x6f   : > { %1629 = vmatprep.subr.mxu1 %v525_v54  ;;  %1655 = vmatprep.subr.mxu0 %v2201_v19 }
  0x70   : > { %1595 = vmatprep.mubr.f32.mxu0 %v359_v14  ;;  %1630 = vmatpush3.msra.mxu1 %v525_v54  ;;  %v2437_v54 = vsub.f32 %v233_v33, %v2423_v51  ;;  %v2447_v2 = vsub.f32 %v236_v58, %v2430_v12 }
  0x71   : > { %1631 = vmatprep.mubr.f32.mxu1 %v2278_v55  ;;  %1656 = vmatpush3.msra.mxu0 %v2201_v19  ;;  %v398_v19 = vsub.f32 %v2412_v36, %v397_v17 }
  0x72   : > { %1596 = vmatmul.mubr.f32.gmra.mxu0 %v369_v43  ;;  %1632 = vmatmul.mubr.f32.vlgmr.msra.gmra.mxu1 %v2280_v56  ;;  %v417_v6 = vand.u32 4294901760, %v2437_v54  ;;  %v427_v38 = vand.u32 4294901760, %v2447_v2 }
  0x73   : > { %1657 = vmatprep.subr.mxu0 %v2204_v20  ;;  %1691 = vmatprep.subr.mxu1 %v2169_v3  ;;  %v399_v58 = vand.u32 4294901760, %v398_v19 }
  0x74   : > { %1658 = vmatpush3.msra.mxu0 %v2204_v20  ;;  %1692 = vmatpush3.msra.mxu1 %v2169_v3  ;;  %v408_v20 = vsub.f32 %v2421_v45, %v407_v53  ;;  %v428_v14 = vsub.f32 %v2447_v2, %v427_v38 }
  0x75   : > { %1659 = vmatprep.subr.mxu0 %v2229_v29  ;;  %1693 = vmatprep.subr.mxu1 %v2171_v4 }
  0x76   : > { %1598 = vmatprep.mubr.f32.mxu0 %v379_v48  ;;  %1634 = vmatprep.mubr.f32.mxu1 %v2298_v1  ;;  %v409_v33 = vand.u32 4294901760, %v408_v20  ;;  %v429_v43 = vand.u32 4294901760, %v428_v14 }
  0x77   : > { %1660 = vmatpush3.msra.mxu0 %v2229_v29  ;;  %1694 = vmatpush3.msra.mxu1 %v2171_v4  ;;  %v418_v29 = vsub.f32 %v2437_v54, %v417_v6 }
  0x78   : > { %1599 = vmatmul.mubr.f32.gmra.mxu0 %v389_v50  ;;  %1635 = vmatmul.mubr.f32.gmra.mxu1 %v2320_v32 }
  0x79   : > { %1661 = vmatprep.subr.mxu0 %v2240_v34  ;;  %1695 = vmatprep.subr.mxu1 %v2173_v5 }
  0x7a   : > { %1662 = vmatpush3.msra.mxu0 %v2240_v34  ;;  %1696 = vmatpush3.msra.mxu1 %v2173_v5  ;;  %v419_v34 = vand.u32 4294901760, %v418_v29 }
  0x7b   : > { %1663 = vmatprep.subr.mxu0 %v2266_v47  ;;  %1697 = vmatprep.subr.mxu1 %v2178_v9 }
  0x7c   : > { %1601 = vmatprep.mubr.f32.mxu0 %v399_v58  ;;  %1637 = vmatprep.mubr.f32.mxu1 %v2349_v62 }
  0x7d   : > { %1664 = vmatpush3.msra.mxu0 %v2266_v47  ;;  %1698 = vmatpush3.msra.mxu1 %v2178_v9  ;;  %v2795_v47 = vand.u32 4294901760, %v2332_v41 }
  0x7e   : > { %1602 = vmatmul.mubr.f32.gmra.mxu0 %v409_v33  ;;  %1638 = vmatmul.mubr.f32.gmra.mxu1 %v2356_v30 }
  0x7f   : > { %1665 = vmatprep.subr.mxu0 %v2272_v52  ;;  %1699 = vmatprep.subr.mxu1 %v2180_v10 }
  0x80   : > { %1666 = vmatpush3.msra.mxu0 %v2272_v52  ;;  %1700 = vmatpush3.msra.mxu1 %v2180_v10  ;;  %v2799_v52 = vand.u32 4294901760, %v2373_v61 }
  0x81   : > { %1667 = vmatprep.subr.mxu0 %v2286_v60  ;;  %1701 = vmatprep.subr.mxu1 %v2182_v11 }
  0x82   : > { %1604 = vmatprep.mubr.f32.mxu0 %v419_v34  ;;  %1640 = vmatprep.mubr.f32.mxu1 %v2366_v31 }
  0x83   : > { %1668 = vmatpush3.msra.mxu0 %v2286_v60  ;;  %1702 = vmatpush3.msra.mxu1 %v2182_v11  ;;  %v2800_v60 = vld [vmem:[#allocation14_spill] sm:$0xff] }
  0x84   : > { %1605 = vmatmul.mubr.f32.gmra.mxu0 %v429_v43  ;;  %1641 = vmatmul.mubr.f32.gmra.mxu1 %v2375_v7 }
  0x85   : > { %1669 = vmatprep.subr.mxu0 %v2317_v25  ;;  %1703 = vmatprep.subr.mxu1 %v2193_v16 }
  0x86   : > { %1670 = vmatpush3.msra.mxu0 %v2317_v25  ;;  %1704 = vmatpush3.msra.mxu1 %v2193_v16 }
  0x87   : > { %1671 = vmatprep.subr.mxu0 %v2336_v42  ;;  %1705 = vmatprep.subr.mxu1 %v2216_v24 }
  0x88   : > { %1643 = vmatprep.mubr.f32.mxu1 %v2398_v13  ;;  %1672 = vmatpush3.msra.mxu0 %v2336_v42 }
  0x89   : > { %1673 = vmatprep.mubr.f32.mxu0 %v2293_v63  ;;  %1706 = vmatpush3.msra.mxu1 %v2216_v24 }
  0x8a   : > { %1644 = vmatmul.mubr.f32.gmra.mxu1 %v2406_v49  ;;  %1674 = vmatmul.mubr.f32.vlgmr.msra.gmra.mxu0 %v2296_v0 }
  0x8b   : > { %1707 = vmatprep.subr.mxu1 %v2223_v27  ;;  %1733 = vmatprep.subr.mxu0 %v2208_v21 }
  0x8c   : > { %1708 = vmatpush3.msra.mxu1 %v2223_v27  ;;  %1734 = vmatpush3.msra.mxu0 %v2208_v21  ;;  %v2791_v21 = vand.u32 4294901760, %v2293_v63 }
  0x8d   : > { %1709 = vmatprep.subr.mxu1 %v2248_v37  ;;  %1735 = vmatprep.subr.mxu0 %v2211_v22 }
  0x8e   : > { %1646 = vmatprep.mubr.f32.mxu1 %v2423_v51  ;;  %1676 = vmatprep.mubr.f32.mxu0 %v2314_v18 }
  0x8f   : > { %1710 = vmatpush3.msra.mxu1 %v2248_v37  ;;  %1736 = vmatpush3.msra.mxu0 %v2211_v22  ;;  %v2792_v22 = vand.u32 4294901760, %v2296_v0 }
  0x90   : > { %1647 = vmatmul.mubr.f32.gmra.mxu1 %v2430_v12  ;;  %1677 = vmatmul.mubr.f32.gmra.mxu0 %v2332_v41 }
  0x91   : > { %1711 = vmatprep.subr.mxu1 %v2257_v44  ;;  %1737 = vmatprep.subr.mxu0 %v2214_v23 }
  0x92   : > { %1712 = vmatpush3.msra.mxu1 %v2257_v44  ;;  %1738 = vmatpush3.msra.mxu0 %v2214_v23  ;;  %v2793_v23 = vld [vmem:[#allocation11_spill] sm:$0xff] }
  0x93   : > { %1713 = vmatprep.subr.mxu1 %v2263_v46  ;;  %1739 = vmatprep.subr.mxu0 %v2221_v26 }
  0x94   : > { %1679 = vmatprep.mubr.f32.mxu0 %v2364_v39  ;;  %1714 = vmatpush3.msra.mxu1 %v2263_v46 }
  0x95   : > { %1715 = vmatprep.mubr.f32.mxu1 %v2791_v21  ;;  %1740 = vmatpush3.msra.mxu0 %v2221_v26  ;;  %v2794_v26 = vand.u32 4294901760, %v2314_v18 }
  0x96   : > { %1680 = vmatmul.mubr.f32.gmra.mxu0 %v2373_v61  ;;  %1716 = vmatmul.mubr.f32.vlgmr.msra.gmra.mxu1 %v2792_v22 }
  0x97   : > { %1741 = vmatprep.subr.mxu0 %v2226_v28  ;;  %1775 = vmatprep.subr.mxu1 %v2169_v3 }
  0x98   : > { %1742 = vmatpush3.msra.mxu0 %v2226_v28  ;;  %1776 = vmatpush3.msra.mxu1 %v2169_v3  ;;  %v2796_v28 = vld [vmem:[#allocation12_spill] sm:$0xff]  ;;  %v2797_v3 = vld [vmem:[#allocation13_spill] sm:$0xff] }
  0x99   : > { %1743 = vmatprep.subr.mxu0 %v2793_v23  ;;  %1777 = vmatprep.subr.mxu1 %v2171_v4 }
  0x9a   : > { %1682 = vmatprep.mubr.f32.mxu0 %v2386_v57  ;;  %1718 = vmatprep.mubr.f32.mxu1 %v2794_v26 }
  0x9b   : > { %1744 = vmatpush3.msra.mxu0 %v2793_v23  ;;  %1778 = vmatpush3.msra.mxu1 %v2171_v4  ;;  %v2798_v4 = vand.u32 4294901760, %v2364_v39 }
  0x9c   : > { %1683 = vmatmul.mubr.f32.gmra.mxu0 %v2396_v35  ;;  %1719 = vmatmul.mubr.f32.gmra.mxu1 %v2795_v47 }
  0x9d   : > { %1745 = vmatprep.subr.mxu0 %v2796_v28  ;;  %1779 = vmatprep.subr.mxu1 %v2173_v5 }
  0x9e   : > { %1746 = vmatpush3.msra.mxu0 %v2796_v28  ;;  %1780 = vmatpush3.msra.mxu1 %v2173_v5  ;;  %v2801_v5 = vld [vmem:[#allocation15_spill] sm:$0xff] }
  0x9f   : > { %1747 = vmatprep.subr.mxu0 %v2797_v3  ;;  %1781 = vmatprep.subr.mxu1 %v2178_v9 }
  0xa0   : > { %1685 = vmatprep.mubr.f32.mxu0 %v2412_v36  ;;  %1721 = vmatprep.mubr.f32.mxu1 %v2798_v4 }
  0xa1   : > { %1748 = vmatpush3.msra.mxu0 %v2797_v3  ;;  %1782 = vmatpush3.msra.mxu1 %v2178_v9  ;;  %v2802_v9 = vld [vmem:[#allocation16_spill] sm:$0xff] }
  0xa2   : > { %1686 = vmatmul.mubr.f32.gmra.mxu0 %v2421_v45  ;;  %1722 = vmatmul.mubr.f32.gmra.mxu1 %v2799_v52 }
  0xa3   : > { %1749 = vmatprep.subr.mxu0 %v2800_v60  ;;  %1783 = vmatprep.subr.mxu1 %v2180_v10 }
  0xa4   : > { %1750 = vmatpush3.msra.mxu0 %v2800_v60  ;;  %1784 = vmatpush3.msra.mxu1 %v2180_v10  ;;  %v2803_v10 = vld [vmem:[#allocation17_spill] sm:$0xff] }
  0xa5   : > { %1751 = vmatprep.subr.mxu0 %v2801_v5  ;;  %1785 = vmatprep.subr.mxu1 %v2182_v11 }
  0xa6   : > { %1688 = vmatprep.mubr.f32.mxu0 %v2437_v54  ;;  %1724 = vmatprep.mubr.f32.mxu1 %v377_v8 }
  0xa7   : > { %1752 = vmatpush3.msra.mxu0 %v2801_v5  ;;  %1786 = vmatpush3.msra.mxu1 %v2182_v11 }
  0xa8   : > { %1689 = vmatmul.mubr.f32.gmra.mxu0 %v2447_v2  ;;  %1725 = vmatmul.mubr.f32.gmra.mxu1 %v387_v59 }
  0xa9   : > { %1753 = vmatprep.subr.mxu0 %v2802_v9  ;;  %1787 = vmatprep.subr.mxu1 %v2193_v16 }
  0xaa   : > { %1754 = vmatpush3.msra.mxu0 %v2802_v9  ;;  %1788 = vmatpush3.msra.mxu1 %v2193_v16 }
  0xab   : > { %1755 = vmatprep.subr.mxu0 %v2803_v10  ;;  %1789 = vmatprep.subr.mxu1 %v2216_v24 }
  0xac   : > { %1727 = vmatprep.mubr.f32.mxu1 %v397_v17  ;;  %1756 = vmatpush3.msra.mxu0 %v2803_v10 }
  0xad   : > { %1757 = vmatprep.mubr.f32.mxu0 %v2278_v55  ;;  %1790 = vmatpush3.msra.mxu1 %v2216_v24 }
  0xae   : > { %1728 = vmatmul.mubr.f32.gmra.mxu1 %v407_v53  ;;  %1758 = vmatmul.mubr.f32.vlgmr.msra.gmra.mxu0 %v2280_v56 }
  0xaf   : > { %1791 = vmatprep.subr.mxu1 %v2223_v27  ;;  %1730 = vmatprep.mubr.f32.mxu1 %v417_v6 }
  0xb0   : > { %1792 = vmatpush3.msra.mxu1 %v2223_v27  ;;  %1760 = vmatprep.mubr.f32.mxu0 %v2298_v1 }
  0xb1   : > { %1793 = vmatprep.subr.mxu1 %v2248_v37 }
  0xb2   : > { %1794 = vmatpush3.msra.mxu1 %v2248_v37  ;;  %1761 = vmatmul.mubr.f32.gmra.mxu0 %v2320_v32 }
  0xb3   : > { %1731 = vmatmul.mubr.f32.gmra.mxu1 %v427_v38  ;;  %1795 = vmatprep.subr.mxu1 %v2257_v44 }
  0xb4   : > { %1796 = vmatpush3.msra.mxu1 %v2257_v44  ;;  %1763 = vmatprep.mubr.f32.mxu0 %v2349_v62 }
  0xb5   : > { %1797 = vmatprep.subr.mxu1 %v2263_v46  ;;  %1799 = vmatprep.mubr.f32.mxu1 %v2278_v55 }
  0xb6   : > { %1798 = vmatpush3.msra.mxu1 %v2263_v46  ;;  %1764 = vmatmul.mubr.f32.gmra.mxu0 %v2356_v30 }
  0xb7   : > { %1800 = vmatmul.mubr.f32.vlgmr.msra.gmra.mxu1 %v2280_v56  ;;  %1766 = vmatprep.mubr.f32.mxu0 %v2366_v31 }
  0xb8   : > { %1802 = vmatprep.mubr.f32.mxu1 %v2298_v1 }
  0xba   : > { %1767 = vmatmul.mubr.f32.gmra.mxu0 %v2375_v7 }
  0xbb   : > { %1803 = vmatmul.mubr.f32.gmra.mxu1 %v2320_v32  ;;  %1769 = vmatprep.mubr.f32.mxu0 %v2398_v13 }
  0xbc   : > { %1805 = vmatprep.mubr.f32.mxu1 %v2349_v62 }
  0xbe   : > { %1770 = vmatmul.mubr.f32.gmra.mxu0 %v2406_v49 }
  0xbf   : > { %1806 = vmatmul.mubr.f32.gmra.mxu1 %v2356_v30  ;;  %1772 = vmatprep.mubr.f32.mxu0 %v2423_v51 }
  0xc0   : > { %1808 = vmatprep.mubr.f32.mxu1 %v2366_v31 }
  0xc2   : > { %1773 = vmatmul.mubr.f32.gmra.mxu0 %v2430_v12 }
  0xc3   : > { %1809 = vmatmul.mubr.f32.gmra.mxu1 %v2375_v7 }
  0xc4   : > { %1811 = vmatprep.mubr.f32.mxu1 %v2398_v13 }
  0xc7   : > { %1812 = vmatmul.mubr.f32.gmra.mxu1 %v2406_v49 }
  0xc8   : > { %1814 = vmatprep.mubr.f32.mxu1 %v2423_v51 }
  0xcb   : > { %1815 = vmatmul.mubr.f32.gmra.mxu1 %v2430_v12 }
 0x127   : > { %v1591_v11 = vpop.f32.mrf.mxu0 }
 0x129   : > { %v321_v16 = vpop.f32.mrf.mxu0 }
 0x12d   : > { %v1594_v24 = vpop.f32.mrf.mxu0 }
 0x12f   : > { %v341_v27 = vpop.f32.mrf.mxu0 }
 0x132   : > { %v1597_v37 = vpop.f32.mrf.mxu0  ;;  %v1633_v44 = vpop.f32.mrf.mxu1 }
 0x133   : > { %v569_v33 = vadd.f32 %v1633_v44, %v1591_v11 }
 0x134   : > { %v2614_v46 = vpop.f32.mrf.mxu0  ;;  %v562_v55 = vpop.f32.mrf.mxu1 }
 0x135   : > { %v563_v34 = vadd.f32 %v562_v55, %v321_v16 }
 0x138   : > { %v2616_v56 = vpop.f32.mrf.mxu0  ;;  %v1636_v63 = vpop.f32.mrf.mxu1 }
 0x139   : > { %v581_v23 = vadd.f32 %v1636_v63, %v1594_v24 }
 0x13a   : > { %v2618_v0 = vpop.f32.mrf.mxu0  ;;  %v574_v1 = vpop.f32.mrf.mxu1 }
 0x13b   : > { %v575_v4 = vadd.f32 %v574_v1, %v341_v27 }
 0x13e   : > { %v2620_v7 = vpop.f32.mrf.mxu0  ;;  %v1639_v18 = vpop.f32.mrf.mxu1 }
 0x13f   : > { %v593_v10 = vadd.f32 %v1639_v18, %v1597_v37 }
 0x140   : > { %v2622_v25 = vpop.f32.mrf.mxu0  ;;  %v586_v32 = vpop.f32.mrf.mxu1 }
 0x141   : > { %v587_v24 = vadd.f32 %v586_v32, %v2614_v46 }
 0x144   : > { %v2624_v41 = vpop.f32.mrf.mxu0  ;;  %v1642_v42 = vpop.f32.mrf.mxu1 }
 0x145   : > { %v605_v1 = vadd.f32 %v1642_v42, %v2616_v56 }
 0x146   : > { %v2626_v57 = vpop.f32.mrf.mxu0  ;;  %v2628_v61 = vpop.f32.mrf.mxu1 }
 0x14a   : > { %v2630_v62 = vpop.f32.mrf.mxu1  ;;  %v1675_v30 = vpop.f32.mrf.mxu0 }
 0x14b   : > { %v732_v43 = vadd.f32 %v1675_v30, %v569_v33  ;;  %v617_v56 = vadd.f32 %v2630_v62, %v2620_v7 }
 0x14c   : > { %v2632_v36 = vpop.f32.mrf.mxu1  ;;  %v724_v39 = vpop.f32.mrf.mxu0 }
 0x14d   : > { %v725_v26 = vadd.f32 %v724_v39, %v563_v34 }
 0x150   : > { %v2634_v31 = vpop.f32.mrf.mxu1  ;;  %v1678_v35 = vpop.f32.mrf.mxu0 }
 0x151   : > { %v746_v52 = vadd.f32 %v1678_v35, %v581_v23  ;;  %v629_v62 = vadd.f32 %v2634_v31, %v2624_v41 }
 0x152   : > { %v2636_v13 = vpop.f32.mrf.mxu1  ;;  %v738_v8 = vpop.f32.mrf.mxu0 }
 0x153   : > { %v739_v44 = vadd.f32 %v738_v8, %v575_v4 }
 0x156   : > { %v1681_v49 = vpop.f32.mrf.mxu0  ;;  %v1717_v59 = vpop.f32.mrf.mxu1 }
 0x157   : > { %v895_v47 = vadd.f32 %v1717_v59, %v732_v43  ;;  %v760_v39 = vadd.f32 %v1681_v49, %v593_v10  ;;  %v599_v49 = vadd.f32 %v2628_v61, %v2618_v0  ;;  %v611_v0 = vadd.f32 %v2632_v36, %v2622_v25 }
 0x158   : > { %v752_v15 = vpop.f32.mrf.mxu0  ;;  %v886_v45 = vpop.f32.mrf.mxu1 }
 0x159   : > { %v887_v60 = vadd.f32 %v886_v45, %v725_v26  ;;  %v753_v35 = vadd.f32 %v752_v15, %v587_v24 }
 0x15c   : > { %v1684_v51 = vpop.f32.mrf.mxu0  ;;  %v1720_v40 = vpop.f32.mrf.mxu1 }
 0x15d   : > { %v911_v16 = vadd.f32 %v1720_v40, %v746_v52 }
 0x15e   : > { %v2638_v17 = vpop.f32.mrf.mxu0  ;;  %v902_v12 = vpop.f32.mrf.mxu1 }
 0x15f   : > { %v903_v59 = vadd.f32 %v902_v12, %v739_v44  ;;  %v774_v12 = vadd.f32 %v1684_v51, %v605_v1  ;;  %v767_v15 = vadd.f32 %v2638_v17, %v599_v49 }
 0x162   : > { %v2640_v48 = vpop.f32.mrf.mxu0  ;;  %v1723_v53 = vpop.f32.mrf.mxu1 }
 0x163   : > { %v927_v8 = vadd.f32 %v1723_v53, %v760_v39 }
 0x164   : > { %v2642_v54 = vpop.f32.mrf.mxu0  ;;  %v918_v50 = vpop.f32.mrf.mxu1 }
 0x168   : > { %v2644_v19 = vpop.f32.mrf.mxu0  ;;  %v1726_v2 = vpop.f32.mrf.mxu1 }
 0x169   : > { %v943_v53 = vadd.f32 %v1726_v2, %v774_v12  ;;  %v781_v2 = vadd.f32 %v2642_v54, %v611_v0 }
 0x16a   : > { %v2646_v20 = vpop.f32.mrf.mxu0  ;;  %v2648_v6 = vpop.f32.mrf.mxu1 }
 0x16e   : > { %v2650_v58 = vpop.f32.mrf.mxu1  ;;  %v1759_v38 = vpop.f32.mrf.mxu0 }
 0x16f   : > { %v1088_v5 = vadd.f32 %v1759_v38, %v895_v47  ;;  %v919_v38 = vadd.f32 %v918_v50, %v753_v35  ;;  %v788_v50 = vadd.f32 %v2640_v48, %v617_v56  ;;  %v935_v47 = vadd.f32 %v2648_v6, %v767_v15 }
 0x170   : > { %v2652_v29 = vpop.f32.mrf.mxu1  ;;  %v1081_v14 = vpop.f32.mrf.mxu0  ;;  %v623_v48 = vadd.f32 %v2636_v13, %v2626_v57 }
 0x171   : > { %v1082_v55 = vadd.f32 %v1081_v14, %v887_v60  ;;  %v959_v4 = vadd.f32 %v2650_v58, %v788_v50  ;;  %v802_v60 = vadd.f32 %v2644_v19, %v629_v62  ;;  %v951_v41 = vadd.f32 %v2652_v29, %v781_v2 }
 0x172   : > { %v1762_v21 = vpop.f32.mrf.mxu0 }
 0x173   : > { %v2654_v22 = vpop.f32.mrf.mxu1  ;;  %v1100_v34 = vadd.f32 %v1762_v21, %v911_v16 }
 0x174   : > { %v1093_v28 = vpop.f32.mrf.mxu0 }
 0x175   : > { %v2656_v3 = vpop.f32.mrf.mxu1  ;;  %v1094_v45 = vadd.f32 %v1093_v28, %v903_v59 }
 0x176   : > { %v1765_v9 = vpop.f32.mrf.mxu0 }
 0x177   : > { %v1801_v11 = vpop.f32.mrf.mxu1  ;;  %v1112_v14 = vadd.f32 %v1765_v9, %v927_v8  ;;  %v975_v9 = vadd.f32 %v2654_v22, %v802_v60 }
 0x178   : > { %v1237_v30 = vadd.f32 %v1801_v11, %v1088_v5  ;;  %v1105_v33 = vpop.f32.mrf.mxu0  ;;  %v795_v5 = vadd.f32 %v2646_v20, %v623_v48 }
 0x179   : > { %v1230_v63 = vpop.f32.mrf.mxu1  ;;  %v1106_v23 = vadd.f32 %v1105_v33, %v919_v38 }
 0x17a   : > { %1301 = vst [vmem:[%s2661_s15 + $0x8] sm:$0xff] %v1237_v30  ;;  %v1231_v27 = vadd.f32 %v1230_v63, %v1082_v55  ;;  %v1768_v37 = vpop.f32.mrf.mxu0  ;;  %v967_v19 = vadd.f32 %v2656_v3, %v795_v5 }
 0x17b   : > { %v1804_v18 = vpop.f32.mrf.mxu1  ;;  %v1124_v28 = vadd.f32 %v1768_v37, %v943_v53 }
 0x17c   : > { %1300 = vst [vmem:[%s2661_s15] sm:$0xff] %v1231_v27  ;;  %v1249_v46 = vadd.f32 %v1804_v18, %v1100_v34  ;;  %v1117_v32 = vpop.f32.mrf.mxu0 }
 0x17d   : > { %v1242_v40 = vpop.f32.mrf.mxu1  ;;  %v1118_v25 = vadd.f32 %v1117_v32, %v935_v47 }
 0x17e   : > { %1303 = vst [vmem:[%s2661_s15 + $0x18] sm:$0xff] %v1249_v46  ;;  %v1243_v43 = vadd.f32 %v1242_v40, %v1094_v45  ;;  %v1771_v21 = vpop.f32.mrf.mxu0 }
 0x17f   : > { %v1807_v42 = vpop.f32.mrf.mxu1  ;;  %v1136_v31 = vadd.f32 %v1771_v21, %v959_v4 }
 0x180   : > { %1302 = vst [vmem:[%s2661_s15 + $0x10] sm:$0xff] %v1243_v43  ;;  %v1261_v26 = vadd.f32 %v1807_v42, %v1112_v14  ;;  %v1129_v61 = vpop.f32.mrf.mxu0 }
 0x181   : > { %v1254_v51 = vpop.f32.mrf.mxu1  ;;  %v1130_v10 = vadd.f32 %v1129_v61, %v951_v41 }
 0x182   : > { %1305 = vst [vmem:[%s2661_s15 + $0x28] sm:$0xff] %v1261_v26  ;;  %v1255_v7 = vadd.f32 %v1254_v51, %v1106_v23  ;;  %v1774_v6 = vpop.f32.mrf.mxu0 }
 0x183   : > { %v1810_v17 = vpop.f32.mrf.mxu1  ;;  %v1148_v29 = vadd.f32 %v1774_v6, %v975_v9 }
 0x184   : > { %1304 = vst [vmem:[%s2661_s15 + $0x20] sm:$0xff] %v1255_v7  ;;  %v1273_v36 = vadd.f32 %v1810_v17, %v1124_v28  ;;  %v1141_v13 = vpop.f32.mrf.mxu0 }
 0x185   : > { %v1266_v52 = vpop.f32.mrf.mxu1  ;;  %v1142_v20 = vadd.f32 %v1141_v13, %v967_v19 }
 0x186   : > { %1307 = vst [vmem:[%s2661_s15 + $0x38] sm:$0xff] %v1273_v36  ;;  %v1267_v54 = vadd.f32 %v1266_v52, %v1118_v25 }
 0x187   : > { %v1813_v58 = vpop.f32.mrf.mxu1 }
 0x188   : > { %1306 = vst [vmem:[%s2661_s15 + $0x30] sm:$0xff] %v1267_v54  ;;  %v1285_v57 = vadd.f32 %v1813_v58, %v1136_v31 }
 0x189   : > { %v1278_v11 = vpop.f32.mrf.mxu1 }
 0x18a   : > { %1309 = vst [vmem:[%s2661_s15 + $0x48] sm:$0xff] %v1285_v57  ;;  %v1279_v44 = vadd.f32 %v1278_v11, %v1130_v10 }
 0x18b   : > { %v1816_v16 = vpop.f32.mrf.mxu1 }
 0x18c   : > { %1308 = vst [vmem:[%s2661_s15 + $0x40] sm:$0xff] %v1279_v44  ;;  %v1297_v22 = vadd.f32 %v1816_v16, %v1148_v29 }
 0x18d   : > { %v1290_v55 = vpop.f32.mrf.mxu1 }
 0x18e   : > { %1311 = vst [vmem:[%s2661_s15 + $0x58] sm:$0xff] %v1297_v22  ;;  %v1291_v3 = vadd.f32 %v1290_v55, %v1142_v20 }
 0x190   : > { %1310 = vst [vmem:[%s2661_s15 + $0x50] sm:$0xff] %v1291_v3 }
 0x191   : > { %1949 = shalt.err (!%p1946_p0)
}
 0x192   : > { %s1950_s4 = scalar_lea.hbm %s2699_s20, 1536  ;;  %s1954_s7 = scalar_lea.hbm %s2748_s2, 3072 }
 0x193   : > { %p1951_p11 = scmp.ne.s32.totalorder %s2699_s20, %s1950_s4  ;;  %p1955_p6 = scmp.lt.s32.totalorder %s2699_s20, %s2748_s2 }
 0x194   : > { %p1956_p7 = scmp.lt.s32.totalorder %s1954_s7, %s1950_s4 }
 0x195   : > { %p1952_p2 = pnand %p1951_p11, %p2804_p3 }
 0x196   : > { %p1957_p4 = por %p1956_p7, %p1955_p6 }
 0x197   : > { %p1953_p1 = pneg %p1952_p2 }
 0x199   : > { %p1958_p8 = pnand %p1957_p4, %p1953_p1 }
 0x19b   : > { %1961 = shalt.err (!%p1958_p8)
}
 0x19c   : > { %s2011_s22 = smov 128   ;;  %s2012_s25 = smov 8  }
 0x19d   : > { %1827 = dma.vmem_to_hbm [thread:$0]  (%p2804_p3), %s2701_s26, 1536, %s2699_s20, %s1313_s13, %s2011_s22, %s2011_s22, %s2012_s25  }
 0x19e PF: > { %s1341_s15 = sand.u32 1, %s1992_s9   ;;  %p2805_p5 = scmp.ne.s32.totalorder %s2773_s16, 0 }
 0x19f   : > { %p2806_p9 = scmp.ge.s32.totalorder %s2004_s12, 2  ;;  %s1342_s17 = scalar_lea.sflag [#allocation4], %s1341_s15 }
 0x1a1   : > { %p1838_p10 = pnand %p2806_p9, %p2805_p5 }
 0x1a3   : > { %p1839_p12 = pneg %p1838_p10 }
 0x1a5   : > { %1987 = dma.done.wait (%p1839_p12), %s1342_s17, 1536  }
 0x1a6   : > { %1989 = vsyncadd (%p1839_p12), %s1342_s17, 4294965760  ;;  %p16_p13 = scmp.ge.s32.totalorder %s2082_s21, 4   ;;  %s2807_s9 = smov %s1996_s10 }
 0x1a7   : > { %s2808_s10 = smov %s2000_s11  ;;  %s2809_s11 = smov %s2102_s29 }
 0x1a8   : > { %s2810_s12 = smov %s2082_s21  ;;  %18 = sbr.rel (!%p16_p13) target bundleno = 6 (0x6), region = 78 }
 0x1ad   :  { %1347 = vsyncpa [#allocation3], 1 }
 0x1ae   :  { %1349 = vsyncpa [#allocation3 + $0x1], 1 }
 0x1af   :  { %1350 = vsyncpa [#allocation6], 1 }
 0x1b0   :  { %1352 = vsyncpa [#allocation6 + $0x1], 1 }
 0x1b1   :  { %1353 = vsyncpa [#allocation4], 1 }
 0x1b2   :  { %1355 = vsyncpa [#allocation4 + $0x1], 1 }

</bundles_post_ra>
